<compile_context>
chip_gen: v5e
topology: v5e:2x2
jax: 0.10.0
libtpu: 0.0.40
codegen_flags: <defaults>
</compile_context>

<pallas_src>
import functools

import jax
import jax.numpy as jnp
from jax.experimental import pallas as pl
from jax.experimental.pallas import tpu as pltpu

_LANE = 128
# (2048, 128) f32 = 1 MiB per pipeline buffer.
_MAX_BLOCK_ROWS = 2048


def _mse_sum_kernel(x_ref, t_ref, o_ref, acc_ref, *, block_rows, steps, valid_rows):
    """Accumulate sum((x - t)^2) for one parallel chunk over the inner axis."""
    p = pl.program_id(0)
    i = pl.program_id(1)

    @pl.when(i == 0)
    def _init():
        acc_ref[...] = jnp.zeros_like(acc_ref)

    d = x_ref[...].astype(jnp.float32) - t_ref[...].astype(jnp.float32)

    # Mask rows past the valid extent: covers the ragged final block and any
    # clamped/duplicated blocks introduced by the ragged parallel split.
    blk = p * steps + i
    row = blk * block_rows + jax.lax.broadcasted_iota(jnp.int32, d.shape, 0)
    d = jnp.where(row < valid_rows, d, 0.0)

    # Hot loop stays VALU-only (no per-step XLU reduce, no scalar RMW).
    acc_ref[...] += d * d

    @pl.when(i == pl.num_programs(1) - 1)
    def _finalize():
        # One-time cross-lane/cross-sublane reduction per chunk.
        o_ref[...] = jnp.sum(acc_ref[...], keepdims=True)


def _sum_squared_diff(x2d, t2d):
    """sum((x2d - t2d)^2) over a lane-dense (rows, 128) pair of arrays."""
    rows, cols = x2d.shape
    assert cols == _LANE and rows > 0

    # Either a full-extent block (small inputs) or a multiple-of-8 block; the
    # last block of a big input may be ragged and is masked in-kernel.
    block_rows = rows if rows <= _MAX_BLOCK_ROWS else _MAX_BLOCK_ROWS
    nblocks = pl.cdiv(rows, block_rows)
    n_parallel = 2 if nblocks >= 2 else 1  # 2 TensorCores on v7x; harmless elsewhere
    steps = pl.cdiv(nblocks, n_parallel)

    def in_map(p, i):
        # Clamp so the ragged parallel split never indexes past the array;
        # the in-kernel row mask zeroes any duplicated contribution.
        return (jnp.minimum(p * steps + i, nblocks - 1), 0)

    kernel = functools.partial(
        _mse_sum_kernel, block_rows=block_rows, steps=steps, valid_rows=rows
    )

    n_elems = rows * _LANE
    itemsize = jnp.dtype(x2d.dtype).itemsize
    cost = pl.CostEstimate(
        flops=3 * n_elems,
        transcendentals=0,
        bytes_accessed=2 * n_elems * itemsize + 4 * n_parallel,
    )

    partials = pl.pallas_call(
        kernel,
        out_shape=jax.ShapeDtypeStruct((n_parallel, 1), jnp.float32),
        grid_spec=pltpu.PrefetchScalarGridSpec(
            num_scalar_prefetch=0,
            grid=(n_parallel, steps),
            in_specs=[
                pl.BlockSpec((block_rows, _LANE), in_map),
                pl.BlockSpec((block_rows, _LANE), in_map),
            ],
            out_specs=pl.BlockSpec((1, 1), lambda p, i: (p, 0)),
            scratch_shapes=[pltpu.VMEM((block_rows, _LANE), jnp.float32)],
        ),
        compiler_params=pltpu.CompilerParams(
            dimension_semantics=("parallel", "arbitrary"),
        ),
        cost_estimate=cost,
    )(x2d, t2d)
    return jnp.sum(partials)


def crm_loss_forward(x, t):
    """Mimics CrmLoss.forward: x, t are sequences of arrays; uses x[0], t[0]."""
    x0 = x[0]
    t0 = t[0]
    assert x0.shape == t0.shape
    batch = x0.shape[0]

    # Flatten in native dtype (free for contiguous inputs); the kernel upcasts
    # to f32 in VMEM, so bf16 inputs stream at half the HBM bytes.
    xf = jnp.ravel(x0)
    tf = jnp.ravel(t0)
    n = xf.shape[0]
    n_main = (n // _LANE) * _LANE

    sq_sum = jnp.float32(0.0)
    if n_main > 0:
        if n_main == n:
            x_head, t_head = xf, tf
        else:
            x_head, t_head = xf[:n_main], tf[:n_main]
        sq_sum = _sum_squared_diff(
            x_head.reshape(-1, _LANE), t_head.reshape(-1, _LANE)
        )
    if n_main != n:
        # Tiny (<128-element) ragged tail in plain JAX; avoids materializing
        # full zero-padded copies of both inputs in HBM.
        dt = xf[n_main:].astype(jnp.float32) - tf[n_main:].astype(jnp.float32)
        sq_sum = sq_sum + jnp.sum(dt * dt)

    activity_loss = sq_sum / jnp.float32(batch)
    return [activity_loss]


if __name__ == "__main__":
    key = jax.random.PRNGKey(0)
    k1, k2, k3, k4 = jax.random.split(key, 4)

    # Case 1: NCHW, lane-aligned element count (typical dense head output).
    x0 = jax.random.normal(k1, (2, 4, 16, 16), dtype=jnp.float32)
    t0 = jax.random.normal(k2, (2, 4, 16, 16), dtype=jnp.float32)
    loss = jax.block_until_ready(crm_loss_forward([x0], [t0])[0])
    ref = jnp.sum((x0 - t0) ** 2) / x0.shape[0]
    assert jnp.allclose(loss, ref, rtol=1e-5, atol=1e-5), (loss, ref)

    # Case 2: ragged element count (exercises the in-kernel mask + JAX tail).
    x1 = jax.random.normal(k3, (2, 3, 17, 19), dtype=jnp.float32)
    t1 = jax.random.normal(k4, (2, 3, 17, 19), dtype=jnp.float32)
    loss1 = jax.block_until_ready(crm_loss_forward([x1], [t1])[0])
    ref1 = jnp.sum((x1 - t1) ** 2) / x1.shape[0]
    assert jnp.allclose(loss1, ref1, rtol=1e-5, atol=1e-5), (loss1, ref1)

    print("KERNEL_OK")
</pallas_src>

<mosaic_0001>
module attributes {stable_mosaic.version = 11 : i64} {
  func.func @_mse_sum_kernel(%arg0: i32, %arg1: i32, %arg2: memref<16x128xf32, #tpu.memory_space<vmem>>, %arg3: memref<16x128xf32, #tpu.memory_space<vmem>>, %arg4: memref<1x1xf32, #tpu.memory_space<vmem>>, %arg5: memref<16x128xf32, #tpu.memory_space<vmem>>) attributes {dimension_semantics = [#tpu.dimension_semantics<parallel>, #tpu.dimension_semantics<arbitrary>], iteration_bounds = array<i64: 1, 1>, scalar_prefetch = 0 : i64, scratch_operands = 1 : i64, tpu.core_type = #tpu.core_type<tc>, window_params = [{transform_indices = @transform_0, window_bounds = array<i64: 16, 128>}, {transform_indices = @transform_1, window_bounds = array<i64: 16, 128>}, {transform_indices = @transform_2, window_bounds = array<i64: 1, 1>}]} {
    %c0_i32 = arith.constant 0 : i32
    %0 = arith.cmpi eq, %arg1, %c0_i32 : i32
    %1 = arith.extui %0 : i1 to i32
    %c0_i32_0 = arith.constant 0 : i32
    %2 = arith.cmpi ne, %1, %c0_i32_0 : i32
    scf.if %2 {
      %cst_11 = arith.constant 0.000000e+00 : f32
      %23 = vector.broadcast %cst_11 : f32 to vector<16x128xf32>
      %c0_12 = arith.constant 0 : index
      %c0_13 = arith.constant 0 : index
      %24 = vector.load %arg5[%c0_12, %c0_13] : memref<16x128xf32, #tpu.memory_space<vmem>>, vector<16x128xf32>
      tpu.vector_store %arg5[%c0_12, %c0_13], %23 {strides = array<i32>} : memref<16x128xf32, #tpu.memory_space<vmem>>, vector<16x128xf32>,
    } else {
    }
    %c0 = arith.constant 0 : index
    %c0_1 = arith.constant 0 : index
    %3 = vector.load %arg2[%c0, %c0_1] : memref<16x128xf32, #tpu.memory_space<vmem>>, vector<16x128xf32>
    %c0_2 = arith.constant 0 : index
    %c0_3 = arith.constant 0 : index
    %4 = vector.load %arg3[%c0_2, %c0_3] : memref<16x128xf32, #tpu.memory_space<vmem>>, vector<16x128xf32>
    %5 = arith.subf %3, %4 : vector<16x128xf32>
    %c1_i32 = arith.constant 1 : i32
    %6 = arith.muli %arg0, %c1_i32 : i32
    %7 = arith.addi %6, %arg1 : i32
    %c16_i32 = arith.constant 16 : i32
    %8 = arith.muli %7, %c16_i32 : i32
    %9 = tpu.iota {dimensions = array<i32: 0>} : vector<16x128xi32>
    %10 = vector.broadcast %8 : i32 to vector<16x128xi32>
    %11 = arith.addi %10, %9 : vector<16x128xi32>
    %c16_i32_4 = arith.constant 16 : i32
    %12 = vector.broadcast %c16_i32_4 : i32 to vector<16x128xi32>
    %13 = arith.cmpi slt, %11, %12 : vector<16x128xi32>
    %cst = arith.constant 0.000000e+00 : f32
    %14 = vector.broadcast %cst : f32 to vector<16x128xf32>
    %15 = arith.select %13, %5, %14 : vector<16x128xi1>, vector<16x128xf32>
    %c0_5 = arith.constant 0 : index
    %c0_6 = arith.constant 0 : index
    %16 = vector.load %arg5[%c0_5, %c0_6] : memref<16x128xf32, #tpu.memory_space<vmem>>, vector<16x128xf32>
    %17 = arith.mulf %15, %15 : vector<16x128xf32>
    %18 = arith.addf %16, %17 : vector<16x128xf32>
    %c0_7 = arith.constant 0 : index
    %c0_8 = arith.constant 0 : index
    %19 = vector.load %arg5[%c0_7, %c0_8] : memref<16x128xf32, #tpu.memory_space<vmem>>, vector<16x128xf32>
    tpu.vector_store %arg5[%c0_7, %c0_8], %18 {strides = array<i32>} : memref<16x128xf32, #tpu.memory_space<vmem>>, vector<16x128xf32>,
    %c0_i32_9 = arith.constant 0 : i32
    %20 = arith.cmpi eq, %arg1, %c0_i32_9 : i32
    %21 = arith.extui %20 : i1 to i32
    %c0_i32_10 = arith.constant 0 : i32
    %22 = arith.cmpi ne, %21, %c0_i32_10 : i32
    scf.if %22 {
      %c0_11 = arith.constant 0 : index
      %c0_12 = arith.constant 0 : index
      %23 = vector.load %arg5[%c0_11, %c0_12] : memref<16x128xf32, #tpu.memory_space<vmem>>, vector<16x128xf32>
      %24 = vector.shape_cast %23 : vector<16x128xf32> to vector<1x16x128xf32>
      %cst_13 = arith.constant dense<0.000000e+00> : vector<1xf32>
      %25 = vector.multi_reduction <add>, %24, %cst_13 [1, 2] : vector<1x16x128xf32> to vector<1xf32>
      %26 = vector.shape_cast %25 : vector<1xf32> to vector<1x1x1xf32>
      %27 = vector.extract %26[0, 0, 0] : f32 from vector<1x1x1xf32>
      %28 = vector.broadcast %27 : f32 to vector<1x1xf32>
      %c0_14 = arith.constant 0 : index
      %c0_15 = arith.constant 0 : index
      %29 = vector.load %arg4[%c0_14, %c0_15] : memref<1x1xf32, #tpu.memory_space<vmem>>, vector<1x1xf32>
      tpu.vector_store %arg4[%c0_14, %c0_15], %28 {strides = array<i32>} : memref<1x1xf32, #tpu.memory_space<vmem>>, vector<1x1xf32>,
    } else {
    }
    return
  }
  func.func @transform_0(%arg0: i32, %arg1: i32) -> (i32, i32) {
    %c1_i32 = arith.constant 1 : i32
    %0 = arith.muli %arg0, %c1_i32 : i32
    %1 = arith.addi %0, %arg1 : i32
    %c0_i32 = arith.constant 0 : i32
    %2 = arith.minsi %1, %c0_i32 : i32
    %c0_i32_0 = arith.constant 0 : i32
    %c0_i32_1 = arith.constant 0 : i32
    return %2, %c0_i32_0 : i32, i32
  }
  func.func @transform_1(%arg0: i32, %arg1: i32) -> (i32, i32) {
    %c1_i32 = arith.constant 1 : i32
    %0 = arith.muli %arg0, %c1_i32 : i32
    %1 = arith.addi %0, %arg1 : i32
    %c0_i32 = arith.constant 0 : i32
    %2 = arith.minsi %1, %c0_i32 : i32
    %c0_i32_0 = arith.constant 0 : i32
    %c0_i32_1 = arith.constant 0 : i32
    return %2, %c0_i32_0 : i32, i32
  }
  func.func @transform_2(%arg0: i32, %arg1: i32) -> (i32, i32) {
    %c0_i32 = arith.constant 0 : i32
    %c0_i32_0 = arith.constant 0 : i32
    return %arg0, %c0_i32 : i32, i32
  }
}

</mosaic_0001>

<bundles_post_ra>
// kernel: tpu_custom_call.1
= control target key start
LH: loop header
LB: loop body
LE: loop exit
PB: predicated region body
PF: predicated region fallthrough
CT: control target
= control target key end

     0   :  { %7 = vsyncpa [#allocation4], 0  ;;  %s250_s0 = inlined_call_operand.hbm [shape: f32[16,128], index: 0, kind: input, shape index: {}]   ;;  %s251_s1 = inlined_call_operand.hbm [shape: f32[16,128], index: 1, kind: input, shape index: {}]   ;;  %s252_s2 = inlined_call_operand.hbm [shape: f32[1,1], index: 2, kind: output, shape index: {}]  }
   0x1   :  { %8 = vsyncpa [#allocation7], 0 }
   0x2   :  { %9 = vsyncpa [#allocation5], 0  ;;  %s20_s11 = sshll.u32 %s250_s0, 4  ;;  %s221_s12 = smov [#allocation3]   ;;  %s21_s11 = int_to_ptr.hbm [resolvable:$true] %s20_s11 }
   0x3   :  { %s22_s13 = sshll.u32 %s221_s12, 4  ;;  %s39_s16 = sshll.u32 %s251_s1, 4  ;;  %s23_s13 = int_to_ptr.vmem [resolvable:$true] %s22_s13  ;;  %s40_s16 = int_to_ptr.hbm [resolvable:$true] %s39_s16 }
   0x4   :  { %s222_s17 = smov 128   ;;  %s223_s18 = smov 8  }
   0x5   :  { %28 = dma.hbm_to_vmem [thread:$0]  %s21_s11, 256, %s23_s13, [#allocation4], %s222_s17, %s222_s17, %s223_s18  }
   0x6   :  { %s224_s19 = smov [#allocation6]  }
   0x7   :  { %s41_s20 = sshll.u32 %s224_s19, 4  ;;  %s42_s20 = int_to_ptr.vmem [resolvable:$true] %s41_s20 }
   0x8   :  { %47 = dma.hbm_to_vmem [thread:$0]  %s40_s16, 256, %s42_s20, [#allocation7], %s222_s17, %s222_s17, %s223_s18  }
   0x9   :  { %215 = dma.done.wait [#allocation4], 256  }
   0xa   :  { %216 = vsyncadd [#allocation4], 4294967040 }
   0xb   :  { %217 = dma.done.wait [#allocation7], 256  }
   0xc   :  { %218 = vsyncadd [#allocation7], 4294967040  ;;  %v70_v0 = vld [vmem:[#allocation3] sm:$0xff]  ;;  %v71_v1 = vld [vmem:[#allocation3 + $0x8] sm:$0xff]  ;;  %s225_s0 = smov [#allocation8]   ;;  %s121_s23 = sshll.u32 %s252_s2, 4  ;;  %s122_s23 = int_to_ptr.hbm [resolvable:$true] %s121_s23 }
   0xd   :  { %v72_v2 = vld [vmem:[#allocation6] sm:$0xff]  ;;  %v73_v3 = vld [vmem:[#allocation6 + $0x8] sm:$0xff]  ;;  %s119_s1 = sshll.u32 %s225_s0, 4  ;;  %vm112_vm0 = vcmask 0   ;;  %s120_s1 = int_to_ptr.vmem [resolvable:$true] %s119_s1 }
   0xe   :  { %v74_v4 = vsub.f32 %v70_v0, %v72_v2  ;;  %v75_v5 = vsub.f32 %v71_v1, %v73_v3 }
  0x10   :  { %v90_v6 = vmul.f32 %v74_v4, %v74_v4  ;;  %v91_v7 = vmul.f32 %v75_v5, %v75_v5 }
  0x12   :  { %v101_v8 = vadd.f32 %v91_v7, %v90_v6 }
  0x14   :  { %102 = vadd.xlane.f32.xlu0 %v101_v8 }
  0x87   :  { %v103_v9 = vpop.xlane.xlu0 %102 }
  0x88   :  { %v104_v10 = vrot.slane %v103_v9, 4 }
  0x8a   :  { %v105_v11 = vadd.f32 %v104_v10, %v103_v9 }
  0x8c   :  { %v106_v12 = vrot.slane %v105_v11, 2 }
  0x8e   :  { %v107_v13 = vadd.f32 %v106_v12, %v105_v11 }
  0x90   :  { %v108_v14 = vrot.slane %v107_v13, 1 }
  0x92   :  { %v109_v15 = vadd.f32 %v108_v14, %v107_v13 }
  0x94   :  { %136 = vpush %v109_v15 }
  0xc5   :  { %s137_s24 = spop %136 }
  0xc6   :  { %v111_v16 = vstv %s137_s24 }
  0xc7   :  { %113 = vst.msk [vmem:[#allocation8] sm:$0x1] %vm112_vm0, %v111_v16 }
  0xc8   :  { %124 = dma.vmem_to_hbm [thread:$0]  %s120_s1, 16, %s122_s23, [#allocation5]  }
  0xc9   :  { %219 = dma.done.wait [#allocation5], 16  }
  0xca   :  { %220 = vsyncadd [#allocation5], 4294967280 }
  0xcb   :  { %129 = vsyncpa [#allocation4], 1 }
  0xcc   :  { %130 = vsyncpa [#allocation7], 1 }
  0xcd   :  { %131 = vsyncpa [#allocation5], 1 }

</bundles_post_ra>
